<compile_context>
chip_gen: v7x
topology: tpu7x:2x2x1
jax: 0.10.0
libtpu: 0.0.40
codegen_flags: <defaults>
</compile_context>

<pallas_src>
import functools

import jax
import jax.numpy as jnp
from jax.experimental import pallas as pl
from jax.experimental.pallas import tpu as pltpu


def _critic_kernel(state_ref, action_ref,
                   w1_ref, w23_ref, w4_ref,
                   b1_ref, b23_ref, b4_ref,
                   q_ref):
    H = w23_ref.shape[1]
    S = state_ref.shape[1]
    A = action_ref.shape[1]

    # ---- layer 1 (both heads fused along the output dim), on the VPU -------
    # K = S + A is tiny (3); an MXU push would be nearly empty, so use K
    # unrolled broadcast multiply-adds instead (VALU slots are idle here).
    w1 = w1_ref[...].astype(jnp.float32)          # (S+A, 2H)
    h1 = b1_ref[...]                              # (1, 2H) -> broadcasts to (B, 2H)
    for k in range(S):
        h1 = h1 + state_ref[:, k:k + 1] * w1[k:k + 1, :]
    for k in range(A):
        h1 = h1 + action_ref[:, k:k + 1] * w1[S + k:S + k + 1, :]
    h1 = jnp.maximum(h1, 0.0)                     # (B, 2H)

    h1a = h1[:, :H]                               # head q1 hidden
    h1b = h1[:, H:]                               # head q2 hidden

    # ---- layers 2 & 3 per head: bf16 MXU matmuls, f32 accumulation ---------
    def hidden(h, w2, b2, w3, b3):
        h = jnp.dot(h.astype(jnp.bfloat16), w2,
                    preferred_element_type=jnp.float32) + b2
        h = jnp.maximum(h, 0.0)
        h = jnp.dot(h.astype(jnp.bfloat16), w3,
                    preferred_element_type=jnp.float32) + b3
        return jnp.maximum(h, 0.0)

    h3a = hidden(h1a, w23_ref[0], b23_ref[0:1, :], w23_ref[1], b23_ref[1:2, :])
    h3b = hidden(h1b, w23_ref[2], b23_ref[2:3, :], w23_ref[3], b23_ref[3:4, :])

    # ---- layer 4: both heads through one block-diagonal matmul -> (B, 2) ---
    h3 = jnp.concatenate([h3a, h3b], axis=1)      # (B, 2H), concat at H-lane boundary
    q_ref[...] = jnp.dot(h3.astype(jnp.bfloat16), w4_ref[...],
                         preferred_element_type=jnp.float32) + b4_ref[...]


def pack_critic_params(params):
    """Pack the f32 (in, out) per-layer params into a few kernel-ready arrays."""
    (w1a, b1a), (w2a, b2a), (w3a, b3a), (w4a, b4a) = params["q1"]
    (w1b, b1b), (w2b, b2b), (w3b, b3b), (w4b, b4b) = params["q2"]
    H = w2a.shape[0]

    w1 = jnp.concatenate([w1a, w1b], axis=1).astype(jnp.bfloat16)       # (K, 2H)
    w23 = jnp.stack([w2a, w3a, w2b, w3b]).astype(jnp.bfloat16)          # (4, H, H)
    w4 = jnp.zeros((2 * H, 2), jnp.float32)
    w4 = w4.at[:H, 0:1].set(w4a).at[H:, 1:2].set(w4b)                   # block-diag
    w4 = w4.astype(jnp.bfloat16)                                        # (2H, 2)

    b1 = jnp.concatenate([b1a, b1b], axis=1)                            # (1, 2H) f32
    b23 = jnp.concatenate([b2a, b3a, b2b, b3b], axis=0)                 # (4, H)  f32
    b4 = jnp.concatenate([b4a, b4b], axis=1)                            # (1, 2)  f32
    return {"w1": w1, "w23": w23, "w4": w4, "b1": b1, "b23": b23, "b4": b4}


def critic_forward(state, action, packed):
    """Twin-Q forward.  Returns (q1, q2), each of shape (B, 1)."""
    B = state.shape[0]
    vmem = pl.BlockSpec(memory_space=pltpu.MemorySpace.VMEM)
    q_pair = pl.pallas_call(
        _critic_kernel,
        out_shape=jax.ShapeDtypeStruct((B, 2), jnp.float32),
        in_specs=[vmem] * 8,
        out_specs=vmem,
    )(state, action,
      packed["w1"], packed["w23"], packed["w4"],
      packed["b1"], packed["b23"], packed["b4"])
    return q_pair[:, 0:1], q_pair[:, 1:2]


def _init_linear(key, fan_in, fan_out):
    # Mimics PyTorch nn.Linear default init: U(-1/sqrt(fan_in), 1/sqrt(fan_in)).
    kw, kb = jax.random.split(key)
    bound = 1.0 / jnp.sqrt(jnp.float32(fan_in))
    w = jax.random.uniform(kw, (fan_in, fan_out), jnp.float32, -bound, bound)
    b = jax.random.uniform(kb, (1, fan_out), jnp.float32, -bound, bound)
    return w, b


def init_critic_params(key, state_dim, action_dim, hidden_dim=256):
    dims = [(state_dim + action_dim, hidden_dim),
            (hidden_dim, hidden_dim),
            (hidden_dim, hidden_dim),
            (hidden_dim, 1)]
    params = {}
    for head in ("q1", "q2"):
        layers = []
        for (fi, fo) in dims:
            key, sub = jax.random.split(key)
            layers.append(_init_linear(sub, fi, fo))
        params[head] = layers
    return params


def _reference_forward(state, action, params, cast_bf16=False):
    sa = jnp.concatenate([state, action], axis=1)

    def maybe_cast(w):
        return w.astype(jnp.bfloat16).astype(jnp.float32) if cast_bf16 else w

    def mlp(layers):
        h = sa
        for i, (w, b) in enumerate(layers):
            h = h @ maybe_cast(w) + b
            if i < len(layers) - 1:
                h = jnp.maximum(h, 0.0)
        return h

    return mlp(params["q1"]), mlp(params["q2"])


if __name__ == "__main__":
    # MountainCarContinuous-v0: state_dim=2, action_dim=1.
    state_dim, action_dim, hidden_dim = 2, 1, 256
    batch = 8

    key = jax.random.PRNGKey(0)
    kp, ks, ka = jax.random.split(key, 3)
    params = init_critic_params(kp, state_dim, action_dim, hidden_dim)
    packed = pack_critic_params(params)

    state = jax.random.normal(ks, (batch, state_dim), jnp.float32)
    action = jnp.tanh(jax.random.normal(ka, (batch, action_dim), jnp.float32))

    fwd = jax.jit(functools.partial(critic_forward, packed=packed))
    q1, q2 = fwd(state, action)
    jax.block_until_ready((q1, q2))

    # Correctness checks.
    #  1) Loose check against the pure-f32 reference (weights/activations go
    #     through bf16 on the MXU, so expect ~1e-3..1e-2 absolute deviation).
    #  2) Tighter check against a reference that rounds the weights to bf16,
    #     which isolates MXU/accumulation error from quantization error.
    r1, r2 = _reference_forward(state, action, params)
    rb1, rb2 = _reference_forward(state, action, params, cast_bf16=True)
    assert q1.shape == (batch, 1) and q2.shape == (batch, 1)
    assert jnp.allclose(q1, r1, atol=5e-2, rtol=5e-2)
    assert jnp.allclose(q2, r2, atol=5e-2, rtol=5e-2)
    assert jnp.allclose(q1, rb1, atol=2e-2, rtol=2e-2)
    assert jnp.allclose(q2, rb2, atol=2e-2, rtol=2e-2)

    print("KERNEL_OK")
</pallas_src>

<mosaic_0001>
module attributes {stable_mosaic.version = 11 : i64} {
  func.func @_critic_kernel(%arg0: memref<8x2xf32, #tpu.memory_space<vmem>>, %arg1: memref<8x1xf32, #tpu.memory_space<vmem>>, %arg2: memref<3x512xbf16, #tpu.memory_space<vmem>>, %arg3: memref<4x256x256xbf16, #tpu.memory_space<vmem>>, %arg4: memref<512x2xbf16, #tpu.memory_space<vmem>>, %arg5: memref<1x512xf32, #tpu.memory_space<vmem>>, %arg6: memref<4x256xf32, #tpu.memory_space<vmem>>, %arg7: memref<1x2xf32, #tpu.memory_space<vmem>>, %arg8: memref<8x2xf32, #tpu.memory_space<vmem>>) attributes {dimension_semantics = [], scalar_prefetch = 0 : i64, scratch_operands = 0 : i64, tpu.core_type = #tpu.core_type<tc>} {
    %c0 = arith.constant 0 : index
    %c0_0 = arith.constant 0 : index
    %0 = vector.load %arg2[%c0, %c0_0] : memref<3x512xbf16, #tpu.memory_space<vmem>>, vector<3x512xbf16>
    %1 = arith.extf %0 : vector<3x512xbf16> to vector<3x512xf32>
    %c0_1 = arith.constant 0 : index
    %c0_2 = arith.constant 0 : index
    %2 = vector.load %arg5[%c0_1, %c0_2] : memref<1x512xf32, #tpu.memory_space<vmem>>, vector<1x512xf32>
    %c0_3 = arith.constant 0 : index
    %c0_4 = arith.constant 0 : index
    %3 = vector.load %arg0[%c0_3, %c0_4] : memref<8x2xf32, #tpu.memory_space<vmem>>, vector<8x1xf32>
    %4 = vector.extract_strided_slice %1 {offsets = [0, 0], sizes = [1, 512], strides = [1, 1]} : vector<3x512xf32> to vector<1x512xf32>
    %5 = vector.broadcast %3 : vector<8x1xf32> to vector<8x512xf32>
    %6 = vector.broadcast %4 : vector<1x512xf32> to vector<8x512xf32>
    %7 = arith.mulf %5, %6 : vector<8x512xf32>
    %8 = vector.broadcast %2 : vector<1x512xf32> to vector<8x512xf32>
    %9 = arith.addf %8, %7 : vector<8x512xf32>
    %c0_5 = arith.constant 0 : index
    %c1 = arith.constant 1 : index
    %10 = vector.load %arg0[%c0_5, %c1] : memref<8x2xf32, #tpu.memory_space<vmem>>, vector<8x1xf32>
    %11 = vector.extract_strided_slice %1 {offsets = [1, 0], sizes = [1, 512], strides = [1, 1]} : vector<3x512xf32> to vector<1x512xf32>
    %12 = vector.broadcast %10 : vector<8x1xf32> to vector<8x512xf32>
    %13 = vector.broadcast %11 : vector<1x512xf32> to vector<8x512xf32>
    %14 = arith.mulf %12, %13 : vector<8x512xf32>
    %15 = arith.addf %9, %14 : vector<8x512xf32>
    %c0_6 = arith.constant 0 : index
    %c0_7 = arith.constant 0 : index
    %16 = vector.load %arg1[%c0_6, %c0_7] : memref<8x1xf32, #tpu.memory_space<vmem>>, vector<8x1xf32>
    %17 = vector.extract_strided_slice %1 {offsets = [2, 0], sizes = [1, 512], strides = [1, 1]} : vector<3x512xf32> to vector<1x512xf32>
    %18 = vector.broadcast %16 : vector<8x1xf32> to vector<8x512xf32>
    %19 = vector.broadcast %17 : vector<1x512xf32> to vector<8x512xf32>
    %20 = arith.mulf %18, %19 : vector<8x512xf32>
    %21 = arith.addf %15, %20 : vector<8x512xf32>
    %cst = arith.constant 0.000000e+00 : f32
    %22 = vector.broadcast %cst : f32 to vector<8x512xf32>
    %23 = arith.maximumf %21, %22 : vector<8x512xf32>
    %24 = vector.extract_strided_slice %23 {offsets = [0, 0], sizes = [8, 256], strides = [1, 1]} : vector<8x512xf32> to vector<8x256xf32>
    %25 = vector.extract_strided_slice %23 {offsets = [0, 256], sizes = [8, 256], strides = [1, 1]} : vector<8x512xf32> to vector<8x256xf32>
    %c0_8 = arith.constant 0 : index
    %c0_9 = arith.constant 0 : index
    %c0_10 = arith.constant 0 : index
    %26 = vector.load %arg3[%c0_8, %c0_9, %c0_10] : memref<4x256x256xbf16, #tpu.memory_space<vmem>>, vector<1x256x256xbf16>
    %27 = vector.shape_cast %26 : vector<1x256x256xbf16> to vector<256x256xbf16>
    %c0_11 = arith.constant 0 : index
    %c0_12 = arith.constant 0 : index
    %28 = vector.load %arg6[%c0_11, %c0_12] : memref<4x256xf32, #tpu.memory_space<vmem>>, vector<1x256xf32>
    %c1_13 = arith.constant 1 : index
    %c0_14 = arith.constant 0 : index
    %c0_15 = arith.constant 0 : index
    %29 = vector.load %arg3[%c1_13, %c0_14, %c0_15] : memref<4x256x256xbf16, #tpu.memory_space<vmem>>, vector<1x256x256xbf16>
    %30 = vector.shape_cast %29 : vector<1x256x256xbf16> to vector<256x256xbf16>
    %c1_16 = arith.constant 1 : index
    %c0_17 = arith.constant 0 : index
    %31 = vector.load %arg6[%c1_16, %c0_17] : memref<4x256xf32, #tpu.memory_space<vmem>>, vector<1x256xf32>
    %32 = arith.truncf %24 : vector<8x256xf32> to vector<8x256xbf16>
    %cst_18 = arith.constant dense<0.000000e+00> : vector<8x256xf32>
    %33 = tpu.matmul %32, %27, %cst_18 {dimension_numbers = #tpu.dot_dimension_numbers<[1], [0], [0], [1], [0, 0, 1, 1], [], []>} : vector<8x256xbf16>, vector<256x256xbf16>, vector<8x256xf32> -> vector<8x256xf32>
    %34 = vector.broadcast %28 : vector<1x256xf32> to vector<8x256xf32>
    %35 = arith.addf %33, %34 : vector<8x256xf32>
    %cst_19 = arith.constant 0.000000e+00 : f32
    %36 = vector.broadcast %cst_19 : f32 to vector<8x256xf32>
    %37 = arith.maximumf %35, %36 : vector<8x256xf32>
    %38 = arith.truncf %37 : vector<8x256xf32> to vector<8x256xbf16>
    %cst_20 = arith.constant dense<0.000000e+00> : vector<8x256xf32>
    %39 = tpu.matmul %38, %30, %cst_20 {dimension_numbers = #tpu.dot_dimension_numbers<[1], [0], [0], [1], [0, 0, 1, 1], [], []>} : vector<8x256xbf16>, vector<256x256xbf16>, vector<8x256xf32> -> vector<8x256xf32>
    %40 = vector.broadcast %31 : vector<1x256xf32> to vector<8x256xf32>
    %41 = arith.addf %39, %40 : vector<8x256xf32>
    %cst_21 = arith.constant 0.000000e+00 : f32
    %42 = vector.broadcast %cst_21 : f32 to vector<8x256xf32>
    %43 = arith.maximumf %41, %42 : vector<8x256xf32>
    %c2 = arith.constant 2 : index
    %c0_22 = arith.constant 0 : index
    %c0_23 = arith.constant 0 : index
    %44 = vector.load %arg3[%c2, %c0_22, %c0_23] : memref<4x256x256xbf16, #tpu.memory_space<vmem>>, vector<1x256x256xbf16>
    %45 = vector.shape_cast %44 : vector<1x256x256xbf16> to vector<256x256xbf16>
    %c2_24 = arith.constant 2 : index
    %c0_25 = arith.constant 0 : index
    %46 = vector.load %arg6[%c2_24, %c0_25] : memref<4x256xf32, #tpu.memory_space<vmem>>, vector<1x256xf32>
    %c3 = arith.constant 3 : index
    %c0_26 = arith.constant 0 : index
    %c0_27 = arith.constant 0 : index
    %47 = vector.load %arg3[%c3, %c0_26, %c0_27] : memref<4x256x256xbf16, #tpu.memory_space<vmem>>, vector<1x256x256xbf16>
    %48 = vector.shape_cast %47 : vector<1x256x256xbf16> to vector<256x256xbf16>
    %c3_28 = arith.constant 3 : index
    %c0_29 = arith.constant 0 : index
    %49 = vector.load %arg6[%c3_28, %c0_29] : memref<4x256xf32, #tpu.memory_space<vmem>>, vector<1x256xf32>
    %50 = arith.truncf %25 : vector<8x256xf32> to vector<8x256xbf16>
    %cst_30 = arith.constant dense<0.000000e+00> : vector<8x256xf32>
    %51 = tpu.matmul %50, %45, %cst_30 {dimension_numbers = #tpu.dot_dimension_numbers<[1], [0], [0], [1], [0, 0, 1, 1], [], []>} : vector<8x256xbf16>, vector<256x256xbf16>, vector<8x256xf32> -> vector<8x256xf32>
    %52 = vector.broadcast %46 : vector<1x256xf32> to vector<8x256xf32>
    %53 = arith.addf %51, %52 : vector<8x256xf32>
    %cst_31 = arith.constant 0.000000e+00 : f32
    %54 = vector.broadcast %cst_31 : f32 to vector<8x256xf32>
    %55 = arith.maximumf %53, %54 : vector<8x256xf32>
    %56 = arith.truncf %55 : vector<8x256xf32> to vector<8x256xbf16>
    %cst_32 = arith.constant dense<0.000000e+00> : vector<8x256xf32>
    %57 = tpu.matmul %56, %48, %cst_32 {dimension_numbers = #tpu.dot_dimension_numbers<[1], [0], [0], [1], [0, 0, 1, 1], [], []>} : vector<8x256xbf16>, vector<256x256xbf16>, vector<8x256xf32> -> vector<8x256xf32>
    %58 = vector.broadcast %49 : vector<1x256xf32> to vector<8x256xf32>
    %59 = arith.addf %57, %58 : vector<8x256xf32>
    %cst_33 = arith.constant 0.000000e+00 : f32
    %60 = vector.broadcast %cst_33 : f32 to vector<8x256xf32>
    %61 = arith.maximumf %59, %60 : vector<8x256xf32>
    %62 = tpu.concatenate %43, %61 in 1 : vector<8x256xf32>, vector<8x256xf32> -> vector<8x512xf32>
    %63 = arith.truncf %62 : vector<8x512xf32> to vector<8x512xbf16>
    %c0_34 = arith.constant 0 : index
    %c0_35 = arith.constant 0 : index
    %64 = vector.load %arg4[%c0_34, %c0_35] : memref<512x2xbf16, #tpu.memory_space<vmem>>, vector<512x2xbf16>
    %cst_36 = arith.constant dense<0.000000e+00> : vector<8x2xf32>
    %65 = tpu.matmul %63, %64, %cst_36 {dimension_numbers = #tpu.dot_dimension_numbers<[1], [0], [0], [1], [0, 0, 1, 1], [], []>} : vector<8x512xbf16>, vector<512x2xbf16>, vector<8x2xf32> -> vector<8x2xf32>
    %c0_37 = arith.constant 0 : index
    %c0_38 = arith.constant 0 : index
    %66 = vector.load %arg7[%c0_37, %c0_38] : memref<1x2xf32, #tpu.memory_space<vmem>>, vector<1x2xf32>
    %67 = vector.broadcast %66 : vector<1x2xf32> to vector<8x2xf32>
    %68 = arith.addf %65, %67 : vector<8x2xf32>
    %c0_39 = arith.constant 0 : index
    %c0_40 = arith.constant 0 : index
    %69 = vector.load %arg8[%c0_39, %c0_40] : memref<8x2xf32, #tpu.memory_space<vmem>>, vector<8x2xf32>
    tpu.vector_store %arg8[%c0_39, %c0_40], %68 {strides = array<i32>} : memref<8x2xf32, #tpu.memory_space<vmem>>, vector<8x2xf32>,
    return
  }
}

</mosaic_0001>

<bundles_post_ra>
// kernel: critic_forward.1
= control target key start
LH: loop header
LB: loop body
LE: loop exit
PB: predicated region body
PF: predicated region fallthrough
CT: control target
= control target key end

     0   :  { %v2098_v0 = vmov 0   ;;  %v2099_v7 = vmov 1   ;;  %v42_v11 = vlaneseq  ;;  %vm1558_vm0 = vcmask 15360   ;;  %s2726_s0 = inlined_call_operand.vmem [shape: f32[8,2], index: 0, kind: input, shape index: {}]   ;;  %s2727_s1 = inlined_call_operand.vmem [shape: f32[8,1], index: 1, kind: input, shape index: {}]   ;;  %s2728_s3 = inlined_call_operand.vmem [shape: bf16[4,256,256], index: 3, kind: input, shape index: {}]   ;;  %s2729_s2 = inlined_call_operand.vmem [shape: bf16[3,512], index: 2, kind: input, shape index: {}]   ;;  %s2730_s5 = inlined_call_operand.vmem [shape: f32[1,512], index: 5, kind: input, shape index: {}]   ;;  %s2731_s4 = inlined_call_operand.vmem [shape: bf16[512,2], index: 4, kind: input, shape index: {}]   ;;  %s2732_s6 = inlined_call_operand.vmem [shape: f32[4,256], index: 6, kind: input, shape index: {}]   ;;  %s2733_s7 = inlined_call_operand.vmem [shape: f32[1,2], index: 7, kind: input, shape index: {}]   ;;  %s2734_s8 = inlined_call_operand.vmem [shape: f32[8,2], index: 8, kind: output, shape index: {}]  }
   0x1   :  { %1870 = vset.pattern.permute.xlu0 %v2098_v0  ;;  %v34_v1 = vld [vmem:[%s2726_s0] sm:$0xff]  ;;  %1872 = vset.pattern.permute.xlu1 %v2098_v0  ;;  %v1877_v5 = vld [vmem:[%s2728_s3 + $0x14] ss:$8 sps:$4 sm:$0xff]   ;;  %v1879_v6 = vld [vmem:[%s2728_s3 + $0x10] ss:$8 sps:$4 sm:$0xff]  }
   0x2   :  { %v155_v2 = vld [vmem:[%s2727_s1] sm:$0xff]  ;;  %37 = vperm.xlu0 %1870, %v34_v1   ;;  %v1883_v10 = vld [vmem:[%s2728_s3 + $0x34] ss:$8 sps:$4 sm:$0xff]   ;;  %v1885_v12 = vld [vmem:[%s2728_s3 + $0x30] ss:$8 sps:$4 sm:$0xff]   ;;  %v2178_v14 = vshrl.u32 %v42_v11, 7 }
   0x3   :  { %158 = vperm.xlu1 %1872, %v155_v2   ;;  %v1874_v3 = vld [vmem:[%s2728_s3 + $0x4] ss:$8 sps:$4 sm:$0xff]   ;;  %v1876_v4 = vld [vmem:[%s2728_s3] ss:$8 sps:$4 sm:$0xff]   ;;  %v1889_v16 = vld [vmem:[%s2728_s3 + $0x54] ss:$8 sps:$4 sm:$0xff]  }
   0x4   :  { %450 = vmatprep.subr.bf16.mxu0 %v1874_v3  ;;  %v1880_v8 = vld [vmem:[%s2728_s3 + $0x24] ss:$8 sps:$4 sm:$0xff]   ;;  %v1882_v9 = vld [vmem:[%s2728_s3 + $0x20] ss:$8 sps:$4 sm:$0xff]   ;;  %v2187_v17 = vsub.s32 2, %v2178_v14  ;;  %v2337_v3 = vsub.s32 0, %v2178_v14 }
   0x5   :  { %451 = vmatpush1.bf16.msra.mxu0 %v1876_v4  ;;  %v1886_v13 = vld [vmem:[%s2728_s3 + $0x44] ss:$8 sps:$4 sm:$0xff]   ;;  %v1888_v15 = vld [vmem:[%s2728_s3 + $0x40] ss:$8 sps:$4 sm:$0xff]   ;;  %v1891_v20 = vld [vmem:[%s2728_s3 + $0x50] ss:$8 sps:$4 sm:$0xff]  }
   0x6   :  { %1871 = vset.pattern.permute.xlu0 %v2099_v7  ;;  %452 = vmatprep.subr.bf16.mxu0 %v1877_v5  ;;  %v2192_v18 = vld [vmem:[%s2729_s2] sm:$0xff]  ;;  %v1895_v26 = vld [vmem:[%s2728_s3 + $0x74] ss:$8 sps:$4 sm:$0xff]   ;;  %v1897_v28 = vld [vmem:[%s2728_s3 + $0x70] ss:$8 sps:$4 sm:$0xff]   ;;  %v48_v4 = vsub.s32 4, %v2178_v14 }
   0x7   :  { %108 = vperm.xlu0 %1871, %v34_v1   ;;  %v2197_v19 = vld [vmem:[%s2730_s5] sm:$0xf]  ;;  %v1892_v21 = vld [vmem:[%s2728_s3 + $0x64] ss:$8 sps:$4 sm:$0xff]   ;;  %v2208_v23 = vunpack.c.h.bf16 %v2192_v18  ;;  %v1901_v31 = vld [vmem:[%s2728_s3 + $0x94] ss:$8 sps:$4 sm:$0xff]   ;;  %v31_v2 = vunpack.c.l.bf16 %v2192_v18 }
   0x8   :  { %v94_v22 = vrot.slane %v2197_v19, %v2187_v17  ;;  %v1894_v24 = vld [vmem:[%s2728_s3 + $0x60] ss:$8 sps:$4 sm:$0xff]   ;;  %v1898_v29 = vld [vmem:[%s2728_s3 + $0x84] ss:$8 sps:$4 sm:$0xff]   ;;  %v1903_v32 = vld [vmem:[%s2728_s3 + $0x90] ss:$8 sps:$4 sm:$0xff]  }
   0x9   :  { %453 = vmatpush1.bf16.msra.mxu0 %v1879_v6  ;;  %v172_v25 = vrot.slane %v2208_v23, %v2187_v17  ;;  %v1900_v30 = vld [vmem:[%s2728_s3 + $0x80] ss:$8 sps:$4 sm:$0xff]   ;;  %v1904_v33 = vld [vmem:[%s2728_s3 + $0xa4] ss:$8 sps:$4 sm:$0xff]   ;;  %v1907_v35 = vld [vmem:[%s2728_s3 + $0xb4] ss:$8 sps:$4 sm:$0xff]   ;;  %v53_v11 = vrot.slane %v2208_v23, %v2337_v3 }
   0xa   :  { %454 = vmatprep.subr.bf16.mxu0 %v1880_v8  ;;  %v1906_v34 = vld [vmem:[%s2728_s3 + $0xa0] ss:$8 sps:$4 sm:$0xff]   ;;  %v1909_v36 = vld [vmem:[%s2728_s3 + $0xb0] ss:$8 sps:$4 sm:$0xff]   ;;  %v1910_v37 = vld [vmem:[%s2728_s3 + $0xc4] ss:$8 sps:$4 sm:$0xff]  }
   0xb   :  { %1873 = vset.pattern.permute.xlu0 %v2098_v0  ;;  %v2219_v27 = vrot.slane %v172_v25, %v2187_v17  ;;  %v1912_v38 = vld [vmem:[%s2728_s3 + $0xc0] ss:$8 sps:$4 sm:$0xff]   ;;  %v1913_v39 = vld [vmem:[%s2728_s3 + $0xd4] ss:$8 sps:$4 sm:$0xff]   ;;  %v1915_v40 = vld [vmem:[%s2728_s3 + $0xd0] ss:$8 sps:$4 sm:$0xff]  }
   0xc   :  { %v1916_v41 = vld [vmem:[%s2728_s3 + $0xe4] ss:$8 sps:$4 sm:$0xff]   ;;  %v1918_v42 = vld [vmem:[%s2728_s3 + $0xe0] ss:$8 sps:$4 sm:$0xff]   ;;  %v1919_v43 = vld [vmem:[%s2728_s3 + $0xf4] ss:$8 sps:$4 sm:$0xff]  }
   0xd   :  { %455 = vmatpush1.bf16.msra.mxu0 %v1882_v9  ;;  %v1921_v44 = vld [vmem:[%s2728_s3 + $0xf0] ss:$8 sps:$4 sm:$0xff]   ;;  %v1924_v45 = vld [vmem:[%s2728_s3 + $0x204] ss:$8 sps:$4 sm:$0xff]   ;;  %v1972_v47 = vld [vmem:[%s2728_s3 + $0x100] ss:$8 sps:$4 sm:$0xff]   ;;  %v45_v9 = vrot.slane %v31_v2, %v2337_v3 }
   0xe   :  { %456 = vmatprep.subr.bf16.mxu0 %v1883_v10  ;;  %v1970_v46 = vld [vmem:[%s2728_s3 + $0x104] ss:$8 sps:$4 sm:$0xff]   ;;  %v1973_v48 = vld [vmem:[%s2728_s3 + $0x114] ss:$8 sps:$4 sm:$0xff]   ;;  %v1975_v49 = vld [vmem:[%s2728_s3 + $0x110] ss:$8 sps:$4 sm:$0xff]   ;;  %v49_v10 = vrot.slane %v31_v2, %v48_v4 }
   0xf   :  { %666 = vmatprep.subr.bf16.mxu1 %v1970_v46  ;;  %v1976_v50 = vld [vmem:[%s2728_s3 + $0x124] ss:$8 sps:$4 sm:$0xff]   ;;  %v1978_v51 = vld [vmem:[%s2728_s3 + $0x120] ss:$8 sps:$4 sm:$0xff]   ;;  %v1979_v52 = vld [vmem:[%s2728_s3 + $0x134] ss:$8 sps:$4 sm:$0xff]  }
  0x10   :  { %667 = vmatpush1.bf16.msra.mxu1 %v1972_v47  ;;  %v1981_v53 = vld [vmem:[%s2728_s3 + $0x130] ss:$8 sps:$4 sm:$0xff]   ;;  %v1982_v54 = vld [vmem:[%s2728_s3 + $0x144] ss:$8 sps:$4 sm:$0xff]   ;;  %v1984_v55 = vld [vmem:[%s2728_s3 + $0x140] ss:$8 sps:$4 sm:$0xff]  }
  0x11   :  { %457 = vmatpush1.bf16.msra.mxu0 %v1885_v12  ;;  %668 = vmatprep.subr.bf16.mxu1 %v1973_v48  ;;  %v1985_v56 = vld [vmem:[%s2728_s3 + $0x154] ss:$8 sps:$4 sm:$0xff]   ;;  %v1987_v57 = vld [vmem:[%s2728_s3 + $0x150] ss:$8 sps:$4 sm:$0xff]   ;;  %v1988_v58 = vld [vmem:[%s2728_s3 + $0x164] ss:$8 sps:$4 sm:$0xff]   ;;  %v57_v12 = vrot.slane %v2208_v23, %v48_v4 }
  0x12   :  { %458 = vmatprep.subr.bf16.mxu0 %v1886_v13  ;;  %v1990_v59 = vld [vmem:[%s2728_s3 + $0x160] ss:$8 sps:$4 sm:$0xff]   ;;  %v1991_v60 = vld [vmem:[%s2728_s3 + $0x174] ss:$8 sps:$4 sm:$0xff]   ;;  %v1993_v61 = vld [vmem:[%s2728_s3 + $0x170] ss:$8 sps:$4 sm:$0xff]  }
  0x13   :  { %v1994_v62 = vld [vmem:[%s2728_s3 + $0x184] ss:$8 sps:$4 sm:$0xff]   ;;  %v1996_v63 = vld [vmem:[%s2728_s3 + $0x180] ss:$8 sps:$4 sm:$0xff]   ;;  %v1997_v0 = vld [vmem:[%s2728_s3 + $0x194] ss:$8 sps:$4 sm:$0xff]  }
  0x14   :  { %669 = vmatpush1.bf16.msra.mxu1 %v1975_v49  ;;  %v1999_v1 = vld [vmem:[%s2728_s3 + $0x190] ss:$8 sps:$4 sm:$0xff]   ;;  %v2000_v5 = vld [vmem:[%s2728_s3 + $0x1a4] ss:$8 sps:$4 sm:$0xff]   ;;  %v2344_v6 = vsub.s32 1, %v2178_v14  ;;  %v167_v7 = vsub.s32 6, %v2178_v14 }
  0x15   :  { %459 = vmatpush1.bf16.msra.mxu0 %v1888_v15  ;;  %670 = vmatprep.subr.bf16.mxu1 %v1976_v50  ;;  %v2002_v8 = vld [vmem:[%s2728_s3 + $0x1a0] ss:$8 sps:$4 sm:$0xff]   ;;  %v2003_v13 = vld [vmem:[%s2728_s3 + $0x1b4] ss:$8 sps:$4 sm:$0xff]   ;;  %v117_v15 = vsub.s32 5, %v2178_v14 }
  0x16   :  { %460 = vmatprep.subr.bf16.mxu0 %v1889_v16  ;;  %v97_v16 = vsub.s32 3, %v2178_v14  ;;  %v114_v18 = vrot.slane %v31_v2, %v2344_v6  ;;  %v2005_v25 = vld [vmem:[%s2728_s3 + $0x1b0] ss:$8 sps:$4 sm:$0xff]   ;;  %v77_v14 = vrot.slane %v57_v12, %v2337_v3  ;;  %v2009_v47 = vld [vmem:[%s2728_s3 + $0x1d4] ss:$8 sps:$4 sm:$0xff]  }
  0x18   :  { %671 = vmatpush1.bf16.msra.mxu1 %v1978_v51 }
  0x19   :  { %461 = vmatpush1.bf16.msra.mxu0 %v1891_v20  ;;  %672 = vmatprep.subr.bf16.mxu1 %v1979_v52  ;;  %v164_v20 = vrot.slane %v31_v2, %v2187_v17 }
  0x1a   :  { %462 = vmatprep.subr.bf16.mxu0 %v1892_v21  ;;  %v176_v21 = vrot.slane %v2208_v23, %v167_v7 }
  0x1c   :  { %673 = vmatpush1.bf16.msra.mxu1 %v1981_v53 }
  0x1d   :  { %463 = vmatpush1.bf16.msra.mxu0 %v1894_v24  ;;  %674 = vmatprep.subr.bf16.mxu1 %v1982_v54  ;;  %v168_v24 = vrot.slane %v31_v2, %v167_v7 }
  0x1e   :  { %464 = vmatprep.subr.bf16.mxu0 %v1895_v26  ;;  %v65_v26 = vrot.slane %v45_v9, %v2337_v3 }
  0x20   :  { %675 = vmatpush1.bf16.msra.mxu1 %v1984_v55  ;;  %v2011_v55 = vld [vmem:[%s2728_s3 + $0x1d0] ss:$8 sps:$4 sm:$0xff]  }
  0x21   :  { %465 = vmatpush1.bf16.msra.mxu0 %v1897_v28  ;;  %676 = vmatprep.subr.bf16.mxu1 %v1985_v56  ;;  %v69_v28 = vrot.slane %v49_v10, %v2337_v3 }
  0x22   :  { %466 = vmatprep.subr.bf16.mxu0 %v1898_v29  ;;  %v73_v29 = vrot.slane %v53_v11, %v2337_v3  ;;  %v1922_v11 = vld [vmem:[%s2728_s3 + $0x200] ss:$8 sps:$4 sm:$0xff]  }
  0x24   :  { %677 = vmatpush1.bf16.msra.mxu1 %v1987_v57 }
  0x25   :  { %467 = vmatpush1.bf16.msra.mxu0 %v1900_v30  ;;  %678 = vmatprep.subr.bf16.mxu1 %v1988_v58  ;;  %v2006_v30 = vld [vmem:[%s2728_s3 + $0x1c4] ss:$8 sps:$4 sm:$0xff]  }
  0x26   :  { %468 = vmatprep.subr.bf16.mxu0 %v1901_v31  ;;  %v118_v31 = vrot.slane %v31_v2, %v117_v15 }
  0x28   :  { %679 = vmatpush1.bf16.msra.mxu1 %v1990_v59  ;;  %v138_v48 = vrot.slane %v118_v31, %v2344_v6  ;;  %v1945_v31 = vld [vmem:[%s2728_s3 + $0x274] ss:$8 sps:$4 sm:$0xff]  }
  0x29   :  { %469 = vmatpush1.bf16.msra.mxu0 %v1903_v32  ;;  %680 = vmatprep.subr.bf16.mxu1 %v1991_v60  ;;  %v122_v32 = vrot.slane %v2208_v23, %v2344_v6 }
  0x2a   :  { %470 = vmatprep.subr.bf16.mxu0 %v1904_v33  ;;  %v126_v33 = vrot.slane %v2208_v23, %v117_v15  ;;  %v2008_v23 = vld [vmem:[%s2728_s3 + $0x1c0] ss:$8 sps:$4 sm:$0xff]  }
  0x2b   :  { %v142_v49 = vrot.slane %v122_v32, %v2344_v6  ;;  %v1943_v32 = vld [vmem:[%s2728_s3 + $0x270] ss:$8 sps:$4 sm:$0xff]  }
  0x2c   :  { %681 = vmatpush1.bf16.msra.mxu1 %v1993_v61  ;;  %v146_v50 = vrot.slane %v126_v33, %v2344_v6  ;;  %v1948_v33 = vld [vmem:[%s2728_s3 + $0x284] ss:$8 sps:$4 sm:$0xff]  }
  0x2d   :  { %471 = vmatpush1.bf16.msra.mxu0 %v1906_v34  ;;  %682 = vmatprep.subr.bf16.mxu1 %v1994_v62  ;;  %v86_v34 = vrot.slane %v2197_v19, %v2337_v3 }
  0x2e   :  { %472 = vmatprep.subr.bf16.mxu0 %v1907_v35  ;;  %v98_v35 = vrot.slane %v2197_v19, %v97_v16  ;;  %v1925_v16 = vld [vmem:[%s2728_s3 + $0x210] ss:$8 sps:$4 sm:$0xff]  }
  0x30   :  { %683 = vmatpush1.bf16.msra.mxu1 %v1996_v63 }
  0x31   :  { %473 = vmatpush1.bf16.msra.mxu0 %v1909_v36  ;;  %684 = vmatprep.subr.bf16.mxu1 %v1997_v0  ;;  %v134_v36 = vrot.slane %v114_v18, %v2344_v6  ;;  %v1930_v18 = vld [vmem:[%s2728_s3 + $0x224] ss:$8 sps:$4 sm:$0xff]  }
  0x32   :  { %474 = vmatprep.subr.bf16.mxu0 %v1910_v37 }
  0x34   :  { %685 = vmatpush1.bf16.msra.mxu1 %v1999_v1 }
  0x35   :  { %475 = vmatpush1.bf16.msra.mxu0 %v1912_v38  ;;  %686 = vmatprep.subr.bf16.mxu1 %v2000_v5  ;;  %v184_v38 = vrot.slane %v164_v20, %v2187_v17  ;;  %v1928_v20 = vld [vmem:[%s2728_s3 + $0x220] ss:$8 sps:$4 sm:$0xff]  }
  0x36   :  { %476 = vmatprep.subr.bf16.mxu0 %v1913_v39  ;;  %v196_v39 = vrot.slane %v176_v21, %v2187_v17  ;;  %v1933_v21 = vld [vmem:[%s2728_s3 + $0x234] ss:$8 sps:$4 sm:$0xff]  }
  0x38   :  { %687 = vmatpush1.bf16.msra.mxu1 %v2002_v8 }
  0x39   :  { %477 = vmatpush1.bf16.msra.mxu0 %v1915_v40  ;;  %688 = vmatprep.subr.bf16.mxu1 %v2003_v13  ;;  %v1927_v13 = vld [vmem:[%s2728_s3 + $0x214] ss:$8 sps:$4 sm:$0xff]  }
  0x3a   :  { %478 = vmatprep.subr.bf16.mxu0 %v1916_v41  ;;  %v90_v41 = vrot.slane %v2197_v19, %v2344_v6 }
  0x3c   :  { %689 = vmatpush1.bf16.msra.mxu1 %v2005_v25  ;;  %v1936_v25 = vld [vmem:[%s2728_s3 + $0x244] ss:$8 sps:$4 sm:$0xff]  }
  0x3d   :  { %479 = vmatpush1.bf16.msra.mxu0 %v1918_v42  ;;  %v188_v42 = vrot.slane %v168_v24, %v2187_v17  ;;  %690 = vmatprep.subr.bf16.mxu1 %v2006_v30  ;;  %v1931_v24 = vld [vmem:[%s2728_s3 + $0x230] ss:$8 sps:$4 sm:$0xff]   ;;  %v1940_v30 = vld [vmem:[%s2728_s3 + $0x260] ss:$8 sps:$4 sm:$0xff]  }
  0x3e   :  { %480 = vmatprep.subr.bf16.mxu0 %v1919_v43 }
  0x40   :  { %691 = vmatpush1.bf16.msra.mxu1 %v2008_v23  ;;  %v1963_v23 = vld [vmem:[%s2728_s3 + $0x2d4] ss:$8 sps:$4 sm:$0xff]  }
  0x41   :  { %481 = vmatpush1.bf16.msra.mxu0 %v1921_v44  ;;  %692 = vmatprep.subr.bf16.mxu1 %v2009_v47  ;;  %v1967_v47 = vld [vmem:[%s2728_s3 + $0x2f0] ss:$8 sps:$4 sm:$0xff]  }
  0x42   :  { %952 = vmatprep.subr.bf16.mxu0 %v1924_v45 }
  0x44   :  { %693 = vmatpush1.bf16.msra.mxu1 %v2011_v55  ;;  %v2066_v55 = vld [vmem:[%s2731_s4 + $0x40] sm:$0xff]  }
  0x81   :  { %v38_v37 = vpop.permute.xlu0 %37 }
  0x82   :  { %v159_v40 = vpop.permute.xlu1 %158  ;;  %v78_v43 = vmul.f32 %v65_v26, %v38_v37  ;;  %v79_v44 = vmul.f32 %v69_v28, %v38_v37  ;;  %v80_v45 = vmul.f32 %v73_v29, %v38_v37  ;;  %v81_v46 = vmul.f32 %v77_v14, %v38_v37  ;;  %v1934_v26 = vld [vmem:[%s2728_s3 + $0x240] ss:$8 sps:$4 sm:$0xff]   ;;  %v1939_v28 = vld [vmem:[%s2728_s3 + $0x254] ss:$8 sps:$4 sm:$0xff]   ;;  %v1937_v29 = vld [vmem:[%s2728_s3 + $0x250] ss:$8 sps:$4 sm:$0xff]  }
  0x83   :  { %v199_v51 = vmul.f32 %v2219_v27, %v159_v40  ;;  %v197_v53 = vmul.f32 %v184_v38, %v159_v40  ;;  %v200_v54 = vmul.f32 %v196_v39, %v159_v40  ;;  %v198_v60 = vmul.f32 %v188_v42, %v159_v40  ;;  %v1942_v14 = vld [vmem:[%s2728_s3 + $0x264] ss:$8 sps:$4 sm:$0xff]   ;;  %v1952_v38 = vld [vmem:[%s2728_s3 + $0x2a0] ss:$8 sps:$4 sm:$0xff]   ;;  %v1957_v39 = vld [vmem:[%s2728_s3 + $0x2b4] ss:$8 sps:$4 sm:$0xff]  }
  0x84   :  { %v105_v52 = vadd.f32 %v94_v22, %v80_v45  ;;  %v103_v56 = vadd.f32 %v86_v34, %v78_v43  ;;  %v106_v57 = vadd.f32 %v98_v35, %v81_v46  ;;  %v104_v59 = vadd.f32 %v90_v41, %v79_v44  ;;  %v1946_v34 = vld [vmem:[%s2728_s3 + $0x280] ss:$8 sps:$4 sm:$0xff]   ;;  %v1951_v35 = vld [vmem:[%s2728_s3 + $0x294] ss:$8 sps:$4 sm:$0xff]   ;;  %v1954_v37 = vld [vmem:[%s2728_s3 + $0x2a4] ss:$8 sps:$4 sm:$0xff]  }
  0x85   :  { %v1955_v40 = vld [vmem:[%s2728_s3 + $0x2b0] ss:$8 sps:$4 sm:$0xff]   ;;  %v1960_v41 = vld [vmem:[%s2728_s3 + $0x2c4] ss:$8 sps:$4 sm:$0xff]   ;;  %v1958_v42 = vld [vmem:[%s2728_s3 + $0x2c0] ss:$8 sps:$4 sm:$0xff]  }
  0x86   :  { %v109_v58 = vpop.permute.xlu0 %108  ;;  %v1961_v43 = vld [vmem:[%s2728_s3 + $0x2d0] ss:$8 sps:$4 sm:$0xff]   ;;  %v1966_v44 = vld [vmem:[%s2728_s3 + $0x2e4] ss:$8 sps:$4 sm:$0xff]   ;;  %v1964_v45 = vld [vmem:[%s2728_s3 + $0x2e0] ss:$8 sps:$4 sm:$0xff]  }
  0x87   :  { %v147_v61 = vmul.f32 %v134_v36, %v109_v58  ;;  %v148_v62 = vmul.f32 %v138_v48, %v109_v58  ;;  %v149_v27 = vmul.f32 %v142_v49, %v109_v58  ;;  %v150_v63 = vmul.f32 %v146_v50, %v109_v58  ;;  %v1949_v36 = vld [vmem:[%s2728_s3 + $0x290] ss:$8 sps:$4 sm:$0xff]   ;;  %v1969_v46 = vld [vmem:[%s2728_s3 + $0x2f4] ss:$8 sps:$4 sm:$0xff]   ;;  %v2012_v50 = vld [vmem:[%s2728_s3 + $0x1e4] ss:$8 sps:$4 sm:$0xff]  }
  0x88   :  { %694 = vmatprep.subr.bf16.mxu1 %v2012_v50  ;;  %v2069_v58 = vld [vmem:[%s2731_s4 + $0x8] sm:$0xff]   ;;  %v2065_v50 = vld [vmem:[%s2728_s3 + $0x3f4] ss:$8 sps:$4 sm:$0xff]  }
  0x89   :  { %v151_v0 = vadd.f32 %v147_v61, %v103_v56  ;;  %v153_v17 = vadd.f32 %v149_v27, %v105_v52  ;;  %v154_v19 = vadd.f32 %v150_v63, %v106_v57  ;;  %v152_v22 = vadd.f32 %v148_v62, %v104_v59  ;;  %v2015_v52 = vld [vmem:[%s2728_s3 + $0x1f4] ss:$8 sps:$4 sm:$0xff]   ;;  %v2067_v56 = vld [vmem:[%s2731_s4] sm:$0xff]   ;;  %v2068_v57 = vld [vmem:[%s2731_s4 + $0x48] sm:$0xff]  }
  0x8a   :  { %v2070_v59 = vld [vmem:[%s2731_s4 + $0x50] sm:$0xff]   ;;  %v2072_v61 = vld [vmem:[%s2731_s4 + $0x58] sm:$0xff]   ;;  %v2074_v27 = vld [vmem:[%s2731_s4 + $0x60] sm:$0xff]  }
  0x8b   :  { %v2400_v1 = vadd.f32 %v199_v51, %v153_v17  ;;  %v202_v2 = vadd.f32 %v198_v60, %v152_v22  ;;  %v201_v4 = vadd.f32 %v197_v53, %v151_v0  ;;  %v204_v5 = vadd.f32 %v200_v54, %v154_v19  ;;  %v2014_v51 = vld [vmem:[%s2728_s3 + $0x1e0] ss:$8 sps:$4 sm:$0xff]   ;;  %v2017_v53 = vld [vmem:[%s2728_s3 + $0x1f0] ss:$8 sps:$4 sm:$0xff]   ;;  %v2020_v54 = vld [vmem:[%s2728_s3 + $0x304] ss:$8 sps:$4 sm:$0xff]  }
  0x8c   :  { %695 = vmatpush1.bf16.msra.mxu1 %v2014_v51  ;;  %v2071_v60 = vld [vmem:[%s2731_s4 + $0x10] sm:$0xff]   ;;  %v2073_v62 = vld [vmem:[%s2731_s4 + $0x18] sm:$0xff]   ;;  %v2075_v63 = vld [vmem:[%s2731_s4 + $0x20] sm:$0xff]  }
  0x8d   :  { %v206_v7 = vmax.f32 %v202_v2, 0.0  ;;  %v205_v8 = vmax.f32 %v201_v4, 0.0  ;;  %v208_v9 = vmax.f32 %v204_v5, 0.0  ;;  %v207_v48 = vmax.f32 %v2400_v1, 0.0  ;;  %696 = vmatprep.subr.bf16.mxu1 %v2015_v52  ;;  %v2076_v0 = vld [vmem:[%s2731_s4 + $0x68] sm:$0xff]  }
  0x8e   :  { %v2077_v17 = vld [vmem:[%s2731_s4 + $0x28] sm:$0xff]   ;;  %v241_v19 = vld [vmem:[%s2732_s6] ss:$4 sm:$0x3] }
  0x8f   :  { %v278_v10 = vpack.c.bf16 %v206_v7, %v206_v7  ;;  %v277_v12 = vpack.c.bf16 %v205_v8, %v205_v8  ;;  %v780_v15 = vpack.c.bf16 %v208_v9, %v208_v9  ;;  %v779_v49 = vpack.c.bf16 %v207_v48, %v207_v48 }
  0x90   :  { %697 = vmatpush1.bf16.msra.mxu1 %v2017_v53  ;;  %v283_v22 = vrot.slane %v241_v19, %v2337_v3  ;;  %v287_v1 = vrot.slane %v241_v19, %v2344_v6  ;;  %v2083_v19 = vld [vmem:[%s2731_s4 + $0x80] sm:$0xff]  }
  0x91   :  { %482 = vmatprep.mubr.bf16.mxu0 %v278_v10  ;;  %1168 = vmatprep.subr.bf16.mxu1 %v2020_v54 }
  0x92   :  { %483 = vmatmul.mubr.bf16.vlgmr.msra.gmra.mrb[0].mxu0 %v277_v12 }
  0x93   :  { %953 = vmatpush1.bf16.msra.mxu0 %v1922_v11  ;;  %984 = vmatprep.mubr.bf16.mxu0 %v780_v15 }
  0x94   :  { %954 = vmatprep.subr.bf16.mxu0 %v1927_v13  ;;  %v2018_v13 = vld [vmem:[%s2728_s3 + $0x300] ss:$8 sps:$4 sm:$0xff]  }
  0x97   :  { %955 = vmatpush1.bf16.msra.mxu0 %v1925_v16  ;;  %v2023_v16 = vld [vmem:[%s2728_s3 + $0x314] ss:$8 sps:$4 sm:$0xff]  }
  0x98   :  { %956 = vmatprep.subr.bf16.mxu0 %v1930_v18  ;;  %v2021_v18 = vld [vmem:[%s2728_s3 + $0x310] ss:$8 sps:$4 sm:$0xff]  }
  0x9b   :  { %957 = vmatpush1.bf16.msra.mxu0 %v1928_v20  ;;  %v2026_v20 = vld [vmem:[%s2728_s3 + $0x324] ss:$8 sps:$4 sm:$0xff]  }
  0x9c   :  { %958 = vmatprep.subr.bf16.mxu0 %v1933_v21  ;;  %v2024_v21 = vld [vmem:[%s2728_s3 + $0x320] ss:$8 sps:$4 sm:$0xff]  }
  0x9f   :  { %959 = vmatpush1.bf16.msra.mxu0 %v1931_v24  ;;  %v2029_v24 = vld [vmem:[%s2728_s3 + $0x334] ss:$8 sps:$4 sm:$0xff]  }
  0xa0   :  { %960 = vmatprep.subr.bf16.mxu0 %v1936_v25  ;;  %v2027_v25 = vld [vmem:[%s2728_s3 + $0x330] ss:$8 sps:$4 sm:$0xff]  }
  0xa3   :  { %961 = vmatpush1.bf16.msra.mxu0 %v1934_v26  ;;  %v2032_v26 = vld [vmem:[%s2728_s3 + $0x344] ss:$8 sps:$4 sm:$0xff]  }
  0xa4   :  { %962 = vmatprep.subr.bf16.mxu0 %v1939_v28  ;;  %v2030_v28 = vld [vmem:[%s2728_s3 + $0x340] ss:$8 sps:$4 sm:$0xff]  }
  0xa7   :  { %963 = vmatpush1.bf16.msra.mxu0 %v1937_v29  ;;  %v2035_v29 = vld [vmem:[%s2728_s3 + $0x354] ss:$8 sps:$4 sm:$0xff]  }
  0xa8   :  { %964 = vmatprep.subr.bf16.mxu0 %v1942_v14  ;;  %v2033_v14 = vld [vmem:[%s2728_s3 + $0x350] ss:$8 sps:$4 sm:$0xff]  }
  0xab   :  { %965 = vmatpush1.bf16.msra.mxu0 %v1940_v30  ;;  %v2038_v30 = vld [vmem:[%s2728_s3 + $0x364] ss:$8 sps:$4 sm:$0xff]  }
  0xac   :  { %966 = vmatprep.subr.bf16.mxu0 %v1945_v31  ;;  %v2036_v31 = vld [vmem:[%s2728_s3 + $0x360] ss:$8 sps:$4 sm:$0xff]  }
  0xaf   :  { %967 = vmatpush1.bf16.msra.mxu0 %v1943_v32  ;;  %v2041_v32 = vld [vmem:[%s2728_s3 + $0x374] ss:$8 sps:$4 sm:$0xff]  }
  0xb0   :  { %968 = vmatprep.subr.bf16.mxu0 %v1948_v33  ;;  %v2039_v33 = vld [vmem:[%s2728_s3 + $0x370] ss:$8 sps:$4 sm:$0xff]  }
  0xb3   :  { %969 = vmatpush1.bf16.msra.mxu0 %v1946_v34  ;;  %v2044_v34 = vld [vmem:[%s2728_s3 + $0x384] ss:$8 sps:$4 sm:$0xff]  }
  0xb4   :  { %970 = vmatprep.subr.bf16.mxu0 %v1951_v35  ;;  %v2042_v35 = vld [vmem:[%s2728_s3 + $0x380] ss:$8 sps:$4 sm:$0xff]  }
  0xb7   :  { %971 = vmatpush1.bf16.msra.mxu0 %v1949_v36  ;;  %v2047_v36 = vld [vmem:[%s2728_s3 + $0x394] ss:$8 sps:$4 sm:$0xff]  }
  0xb8   :  { %972 = vmatprep.subr.bf16.mxu0 %v1954_v37  ;;  %v2045_v37 = vld [vmem:[%s2728_s3 + $0x390] ss:$8 sps:$4 sm:$0xff]  }
  0xbb   :  { %973 = vmatpush1.bf16.msra.mxu0 %v1952_v38  ;;  %v2050_v38 = vld [vmem:[%s2728_s3 + $0x3a4] ss:$8 sps:$4 sm:$0xff]  }
  0xbc   :  { %974 = vmatprep.subr.bf16.mxu0 %v1957_v39  ;;  %v2048_v39 = vld [vmem:[%s2728_s3 + $0x3a0] ss:$8 sps:$4 sm:$0xff]  }
  0xbf   :  { %975 = vmatpush1.bf16.msra.mxu0 %v1955_v40  ;;  %v2053_v40 = vld [vmem:[%s2728_s3 + $0x3b4] ss:$8 sps:$4 sm:$0xff]  }
  0xc0   :  { %976 = vmatprep.subr.bf16.mxu0 %v1960_v41  ;;  %v2051_v41 = vld [vmem:[%s2728_s3 + $0x3b0] ss:$8 sps:$4 sm:$0xff]  }
  0xc3   :  { %977 = vmatpush1.bf16.msra.mxu0 %v1958_v42  ;;  %v2056_v42 = vld [vmem:[%s2728_s3 + $0x3c4] ss:$8 sps:$4 sm:$0xff]  }
  0xc4   :  { %978 = vmatprep.subr.bf16.mxu0 %v1963_v23  ;;  %v2054_v23 = vld [vmem:[%s2728_s3 + $0x3c0] ss:$8 sps:$4 sm:$0xff]  }
  0xc7   :  { %979 = vmatpush1.bf16.msra.mxu0 %v1961_v43  ;;  %v2059_v43 = vld [vmem:[%s2728_s3 + $0x3d4] ss:$8 sps:$4 sm:$0xff]  }
  0xc8   :  { %980 = vmatprep.subr.bf16.mxu0 %v1966_v44  ;;  %v2057_v44 = vld [vmem:[%s2728_s3 + $0x3d0] ss:$8 sps:$4 sm:$0xff]  }
  0xcb   :  { %981 = vmatpush1.bf16.msra.mxu0 %v1964_v45  ;;  %v1693_v45 = vld [vmem:[%s2732_s6 + $0x2] ss:$4 sm:$0x3] }
  0xcc   :  { %982 = vmatprep.subr.bf16.mxu0 %v1969_v46  ;;  %v2062_v46 = vld [vmem:[%s2728_s3 + $0x3e4] ss:$8 sps:$4 sm:$0xff]   ;;  %v789_v48 = vrot.slane %v1693_v45, %v2344_v6 }
  0xcf   :  { %983 = vmatpush1.bf16.msra.mxu0 %v1967_v47  ;;  %v785_v47 = vrot.slane %v1693_v45, %v2337_v3 }
  0xd0   :  { %1824 = vmatprep.subr.bf16.mxu0 %v2066_v55 }
  0xd2   :  { %985 = vmatmul.mubr.bf16.vlgmr.msra.gmra.mrb[4].mxu0 %v779_v49  ;;  %v2060_v49 = vld [vmem:[%s2728_s3 + $0x3e0] ss:$8 sps:$4 sm:$0xff]  }
  0xd3   :  { %1825 = vmatpush3.bf16.msra.mxu0 %v2067_v56  ;;  %v2063_v56 = vld [vmem:[%s2728_s3 + $0x3f0] ss:$8 sps:$4 sm:$0xff]  }
  0xd4   :  { %1826 = vmatprep.subr.bf16.mxu0 %v2068_v57 }
  0xd7   :  { %1827 = vmatpush3.bf16.msra.mxu0 %v2069_v58 }
  0xd8   :  { %1828 = vmatprep.subr.bf16.mxu0 %v2070_v59 }
  0xdb   :  { %1829 = vmatpush3.bf16.msra.mxu0 %v2071_v60 }
  0xdc   :  { %1830 = vmatprep.subr.bf16.mxu0 %v2072_v61 }
  0xdf   :  { %1831 = vmatpush3.bf16.msra.mxu0 %v2073_v62  ;;  %v2078_v62 = vld [vmem:[%s2731_s4 + $0x70] sm:$0xff]  }
  0xe0   :  { %1832 = vmatprep.subr.bf16.mxu0 %v2074_v27  ;;  %v2079_v27 = vld [vmem:[%s2731_s4 + $0x30] sm:$0xff]  }
  0xe3   :  { %1833 = vmatpush3.bf16.msra.mxu0 %v2075_v63  ;;  %v2080_v63 = vld [vmem:[%s2731_s4 + $0x78] sm:$0xff]  }
  0xe4   :  { %1834 = vmatprep.subr.bf16.mxu0 %v2076_v0  ;;  %v2081_v0 = vld [vmem:[%s2731_s4 + $0x38] sm:$0xff]  }
  0xe7   :  { %1835 = vmatpush3.bf16.msra.mxu0 %v2077_v17  ;;  %v2082_v17 = vld [vmem:[%s2731_s4 + $0xc0] sm:$0xff]  }
  0xe8   :  { %1836 = vmatprep.subr.bf16.mxu0 %v2078_v62 }
  0xeb   :  { %1837 = vmatpush3.bf16.msra.mxu0 %v2079_v27 }
  0xec   :  { %1838 = vmatprep.subr.bf16.mxu0 %v2080_v63 }
  0xef   :  { %1839 = vmatpush3.bf16.msra.mxu0 %v2081_v0 }
 0x165   :  { %v484_v2 = vpop.f32.mrb[0].mxu0 }
 0x166   :  { %v485_v4 = vadd.f32 %v484_v2, %v283_v22  ;;  %v486_v5 = vpop.f32.mrb[1].mxu0  ;;  %v2084_v22 = vld [vmem:[%s2731_s4 + $0xc8] sm:$0xff]   ;;  %v2086_v2 = vld [vmem:[%s2731_s4 + $0xd0] sm:$0xff]  }
 0x167   :  { %v487_v7 = vadd.f32 %v486_v5, %v287_v1  ;;  %v488_v8 = vpop.f32.mrb[2].mxu0  ;;  %v2085_v1 = vld [vmem:[%s2731_s4 + $0x88] sm:$0xff]   ;;  %v2088_v5 = vld [vmem:[%s2731_s4 + $0xd8] sm:$0xff]  }
 0x168   :  { %v491_v9 = vmax.f32 %v485_v4, 0.0  ;;  %v489_v10 = vpop.f32.mrb[3].mxu0  ;;  %v2087_v4 = vld [vmem:[%s2731_s4 + $0x90] sm:$0xff]   ;;  %v2090_v8 = vld [vmem:[%s2731_s4 + $0xe0] sm:$0xff]  }
 0x169   :  { %v492_v11 = vmax.f32 %v487_v7, 0.0  ;;  %v2089_v7 = vld [vmem:[%s2731_s4 + $0x98] sm:$0xff]   ;;  %v2092_v10 = vld [vmem:[%s2731_s4 + $0xe8] sm:$0xff]  }
 0x16a   :  { %v493_v15 = vpack.c.bf16 %v491_v9, %v491_v9  ;;  %v2091_v9 = vld [vmem:[%s2731_s4 + $0xa0] sm:$0xff]  }
 0x16b   :  { %v494_v12 = vpack.c.bf16 %v492_v11, %v492_v11  ;;  %v2093_v11 = vld [vmem:[%s2731_s4 + $0xa8] sm:$0xff]  }
 0x16d   :  { %698 = vmatprep.mubr.bf16.mxu1 %v494_v12  ;;  %v2094_v12 = vld [vmem:[%s2731_s4 + $0xf0] sm:$0xff]  }
 0x16e   :  { %699 = vmatmul.mubr.bf16.vlgmr.msra.gmra.mrb[0].mxu1 %v493_v15  ;;  %v2096_v15 = vld [vmem:[%s2731_s4 + $0xf8] sm:$0xff]  }
 0x16f   :  { %1169 = vmatpush1.bf16.msra.mxu1 %v2018_v13  ;;  %v2095_v13 = vld [vmem:[%s2731_s4 + $0xb0] sm:$0xff]  }
 0x170   :  { %1170 = vmatprep.subr.bf16.mxu1 %v2023_v16  ;;  %v2097_v16 = vld [vmem:[%s2731_s4 + $0xb8] sm:$0xff]  }
 0x173   :  { %1171 = vmatpush1.bf16.msra.mxu1 %v2021_v18  ;;  %v1596_v18 = vld [vmem:[%s2732_s6 + $0x1] ss:$4 sm:$0x3] }
 0x174   :  { %1172 = vmatprep.subr.bf16.mxu1 %v2026_v20  ;;  %v499_v20 = vrot.slane %v1596_v18, %v2337_v3 }
 0x177   :  { %1173 = vmatpush1.bf16.msra.mxu1 %v2024_v21  ;;  %v503_v21 = vrot.slane %v1596_v18, %v2344_v6 }
 0x178   :  { %1174 = vmatprep.subr.bf16.mxu1 %v2029_v24 }
 0x17b   :  { %1175 = vmatpush1.bf16.msra.mxu1 %v2027_v25 }
 0x17c   :  { %1176 = vmatprep.subr.bf16.mxu1 %v2032_v26 }
 0x17f   :  { %1177 = vmatpush1.bf16.msra.mxu1 %v2030_v28 }
 0x180   :  { %1178 = vmatprep.subr.bf16.mxu1 %v2035_v29 }
 0x183   :  { %1179 = vmatpush1.bf16.msra.mxu1 %v2033_v14 }
 0x184   :  { %1180 = vmatprep.subr.bf16.mxu1 %v2038_v30 }
 0x187   :  { %1181 = vmatpush1.bf16.msra.mxu1 %v2036_v31 }
 0x188   :  { %1182 = vmatprep.subr.bf16.mxu1 %v2041_v32 }
 0x18b   :  { %1183 = vmatpush1.bf16.msra.mxu1 %v2039_v33 }
 0x18c   :  { %1184 = vmatprep.subr.bf16.mxu1 %v2044_v34  ;;  %v1726_v34 = vld [vmem:[%s2732_s6 + $0x3] ss:$4 sm:$0x3] }
 0x18f   :  { %1185 = vmatpush1.bf16.msra.mxu1 %v2042_v35  ;;  %v1001_v35 = vrot.slane %v1726_v34, %v2337_v3  ;;  %v1791_v3 = vld [vmem:[%s2733_s7] ss:$0 sm:$0xff] }
 0x190   :  { %1186 = vmatprep.subr.bf16.mxu1 %v2047_v36  ;;  %v1005_v36 = vrot.slane %v1726_v34, %v2344_v6 }
 0x193   :  { %1187 = vmatpush1.bf16.msra.mxu1 %v2045_v37 }
 0x194   :  { %1188 = vmatprep.subr.bf16.mxu1 %v2050_v38 }
 0x197   :  { %1189 = vmatpush1.bf16.msra.mxu1 %v2048_v39 }
 0x198   :  { %1190 = vmatprep.subr.bf16.mxu1 %v2053_v40 }
 0x19b   :  { %1191 = vmatpush1.bf16.msra.mxu1 %v2051_v41 }
 0x19c   :  { %1192 = vmatprep.subr.bf16.mxu1 %v2056_v42 }
 0x19f   :  { %1193 = vmatpush1.bf16.msra.mxu1 %v2054_v23 }
 0x1a0   :  { %1194 = vmatprep.subr.bf16.mxu1 %v2059_v43 }
 0x1a3   :  { %1195 = vmatpush1.bf16.msra.mxu1 %v2057_v44 }
 0x1a4   :  { %1196 = vmatprep.subr.bf16.mxu1 %v2062_v46 }
 0x1a5   :  { %v986_v51 = vpop.f32.mrb[4].mxu0 }
 0x1a6   :  { %v987_v52 = vadd.f32 %v986_v51, %v785_v47  ;;  %v988_v53 = vpop.f32.mrb[5].mxu0 }
 0x1a7   :  { %v989_v54 = vadd.f32 %v988_v53, %v789_v48  ;;  %v990_v55 = vpop.f32.mrb[6].mxu0  ;;  %1197 = vmatpush1.bf16.msra.mxu1 %v2060_v49 }
 0x1a8   :  { %v993_v57 = vmax.f32 %v987_v52, 0.0  ;;  %v991_v58 = vpop.f32.mrb[7].mxu0  ;;  %1198 = vmatprep.subr.bf16.mxu1 %v2065_v50 }
 0x1a9   :  { %v994_v59 = vmax.f32 %v989_v54, 0.0 }
 0x1aa   :  { %v995_v61 = vpack.c.bf16 %v993_v57, %v993_v57 }
 0x1ab   :  { %v996_v60 = vpack.c.bf16 %v994_v59, %v994_v59  ;;  %1199 = vmatpush1.bf16.msra.mxu1 %v2063_v56 }
 0x1ac   :  { %1846 = vmatprep.subr.bf16.mxu1 %v2082_v17 }
 0x1ad   :  { %1200 = vmatprep.mubr.bf16.mxu1 %v996_v60 }
 0x1ae   :  { %1201 = vmatmul.mubr.bf16.vlgmr.msra.gmra.mrb[4].mxu1 %v995_v61 }
 0x1af   :  { %1847 = vmatpush3.bf16.msra.mxu1 %v2083_v19 }
 0x1b0   :  { %1848 = vmatprep.subr.bf16.mxu1 %v2084_v22 }
 0x1b3   :  { %1849 = vmatpush3.bf16.msra.mxu1 %v2085_v1 }
 0x1b4   :  { %1850 = vmatprep.subr.bf16.mxu1 %v2086_v2 }
 0x1b7   :  { %1851 = vmatpush3.bf16.msra.mxu1 %v2087_v4 }
 0x1b8   :  { %1852 = vmatprep.subr.bf16.mxu1 %v2088_v5 }
 0x1bb   :  { %1853 = vmatpush3.bf16.msra.mxu1 %v2089_v7 }
 0x1bc   :  { %1854 = vmatprep.subr.bf16.mxu1 %v2090_v8 }
 0x1bf   :  { %1855 = vmatpush3.bf16.msra.mxu1 %v2091_v9 }
 0x1c0   :  { %1856 = vmatprep.subr.bf16.mxu1 %v2092_v10 }
 0x1c3   :  { %1857 = vmatpush3.bf16.msra.mxu1 %v2093_v11 }
 0x1c4   :  { %1858 = vmatprep.subr.bf16.mxu1 %v2094_v12 }
 0x1c7   :  { %1859 = vmatpush3.bf16.msra.mxu1 %v2095_v13 }
 0x1c8   :  { %1860 = vmatprep.subr.bf16.mxu1 %v2096_v15 }
 0x1cb   :  { %1861 = vmatpush3.bf16.msra.mxu1 %v2097_v16 }
 0x241   :  { %v700_v24 = vpop.f32.mrb[0].mxu1 }
 0x242   :  { %v701_v25 = vadd.f32 %v700_v24, %v499_v20  ;;  %v702_v26 = vpop.f32.mrb[1].mxu1 }
 0x243   :  { %v703_v28 = vadd.f32 %v702_v26, %v503_v21  ;;  %v704_v29 = vpop.f32.mrb[2].mxu1 }
 0x244   :  { %v707_v14 = vmax.f32 %v701_v25, 0.0  ;;  %v705_v30 = vpop.f32.mrb[3].mxu1 }
 0x245   :  { %v708_v31 = vmax.f32 %v703_v28, 0.0 }
 0x246   :  { %v1211_v33 = vpack.c.bf16 %v707_v14, %v707_v14 }
 0x247   :  { %v1212_v32 = vpack.c.bf16 %v708_v31, %v708_v31 }
 0x249   :  { %1510 = vmatprep.mubr.bf16.mxu0 %v1212_v32 }
 0x24a   :  { %1511 = vmatmul.mubr.bf16.vlgmr.msra.gmra.mrb[8].mxu0 %v1211_v33 }
 0x281   :  { %v1202_v37 = vpop.f32.mrb[4].mxu1 }
 0x282   :  { %v1203_v38 = vadd.f32 %v1202_v37, %v1001_v35  ;;  %v1204_v39 = vpop.f32.mrb[5].mxu1 }
 0x283   :  { %v1205_v40 = vadd.f32 %v1204_v39, %v1005_v36  ;;  %v1206_v41 = vpop.f32.mrb[6].mxu1 }
 0x284   :  { %v1209_v42 = vmax.f32 %v1203_v38, 0.0  ;;  %v1207_v23 = vpop.f32.mrb[7].mxu1 }
 0x285   :  { %v1210_v43 = vmax.f32 %v1205_v40, 0.0 }
 0x286   :  { %v1213_v45 = vpack.c.bf16 %v1209_v42, %v1209_v42 }
 0x287   :  { %v1214_v44 = vpack.c.bf16 %v1210_v43, %v1210_v43 }
 0x289   :  { %1550 = vmatprep.mubr.bf16.mxu1 %v1214_v44 }
 0x28a   :  { %1551 = vmatmul.mubr.bf16.vlgmr.msra.gmra.mrb[8].mxu1 %v1213_v45 }
 0x31d   :  { %v1840_v46 = vpop.f32.mrb[8].mxu0 }
 0x31e   :  { %v1841_v47 = vpop.f32.mrb[9].mxu0 }
 0x31f   :  { %v1842_v48 = vadd.f32 %v1841_v47, %v1840_v46  ;;  %v1843_v49 = vpop.f32.mrb[10].mxu0 }
 0x320   :  { %v1844_v50 = vpop.f32.mrb[11].mxu0 }
 0x321   :  { %v1513_v52 = vadd.f32 %v1842_v48, %v1791_v3 }
 0x35d   :  { %v1862_v6 = vpop.f32.mrb[8].mxu1 }
 0x35e   :  { %v1863_v51 = vpop.f32.mrb[9].mxu1 }
 0x35f   :  { %v1864_v53 = vadd.f32 %v1863_v51, %v1862_v6  ;;  %v1865_v54 = vpop.f32.mrb[10].mxu1 }
 0x360   :  { %v1866_v55 = vpop.f32.mrb[11].mxu1 }
 0x361   :  { %v1553_v56 = vadd.f32 %v1864_v53, %v1513_v52 }
 0x363   :  { %1559 = vst.msk [vmem:[%s2734_s8] sm:$0xff] %vm1558_vm0, %v1553_v56 }

</bundles_post_ra>
